<compile_context>
chip_gen: v6e
topology: v6e:2x2x1
jax: 0.10.0
libtpu: 0.0.40
codegen_flags: <defaults>
</compile_context>

<pallas_src>
import functools

import jax
import jax.numpy as jnp
from jax.experimental import pallas as pl
from jax.experimental.pallas import tpu as pltpu


def mlp_critic_kernel(x_ref, w1_ref, b1_ref, w2_ref, b2_ref, w3_ref, b3_ref, o_ref,
                      *, tanh_dtype):
    # Layer 1: (2*h1, 2*d_in) @ (2*d_in, TBP) on the MXU, f32 accumulation, f32 bias add.
    a = jnp.dot(w1_ref[...], x_ref[...], preferred_element_type=jnp.float32) + b1_ref[...]
    h = jnp.tanh(a.astype(tanh_dtype))            # bf16 EUP on v6e/v7x, f32 on v5e
    # Layer 2: full (128, 128) x (128, TBP) MXU tile (lane- and sublane-dense).
    a = jnp.dot(w2_ref[...], h.astype(w2_ref.dtype),
                preferred_element_type=jnp.float32) + b2_ref[...]
    h = jnp.tanh(a.astype(tanh_dtype))
    # Value head: (2, 2*h2) @ (2*h2, TBP) -> (2, TBP); row 0 = first batch half,
    # row 1 = second batch half.  Already lane-dense -> single unmasked store per step.
    v = jnp.dot(w3_ref[...], h.astype(w3_ref.dtype),
                preferred_element_type=jnp.float32) + b3_ref[...]
    o_ref[...] = v.astype(o_ref.dtype)


def _round_up(x, m):
    return ((x + m - 1) // m) * m


def _block_diag2(a):
    """block_diag(a, a) without depending on jax.scipy."""
    z = jnp.zeros_like(a)
    top = jnp.concatenate([a, z], axis=1)
    bot = jnp.concatenate([z, a], axis=1)
    return jnp.concatenate([top, bot], axis=0)


def _auto_tanh_dtype():
    """bf16 tanh on chips with a bf16 EUP path (v6e / v7x); f32 otherwise (v5e, unknown)."""
    try:
        kind = jax.devices()[0].device_kind.lower()
    except Exception:  # pragma: no cover - defensive
        return jnp.float32
    if "v6" in kind or "v7" in kind:
        return jnp.bfloat16
    return jnp.float32


def mlp_critic_forward(obs, params, *, block_batch=4096,
                       compute_dtype=jnp.bfloat16, tanh_dtype=None):
    """Fused MLP critic forward. Returns value estimates of shape (B,).

    block_batch:   original batch rows per grid step (packed tile = block_batch // 2 lanes).
    compute_dtype: MXU input dtype for obs / weights (default bf16 on all generations);
                   accumulation + bias adds stay f32.
    tanh_dtype:    dtype for the tanh (EUP) path; None -> auto (bf16 on v6e/v7x, f32 on
                   v5e), forced to f32 when compute_dtype is f32.
    """
    w1, b1, w2, b2, w3, b3 = params
    B, d_in = obs.shape
    h1 = w1.shape[1]
    h2 = w2.shape[1]

    if compute_dtype is None:
        compute_dtype = jnp.float32
    if tanh_dtype is None:
        if jnp.dtype(compute_dtype) == jnp.dtype(jnp.float32):
            tanh_dtype = jnp.float32
        else:
            tanh_dtype = _auto_tanh_dtype()

    # ---- wrapper-side layout plumbing (one-time, tiny) -------------------------------
    # Pack two batch rows per lane column: first half of the batch -> sublanes [0, d_in),
    # second half -> sublanes [d_in, 2*d_in).  Odd B gets one zero-padded row (dropped below).
    B_half = (B + 1) // 2
    obs_pad = obs if 2 * B_half == B else jnp.pad(obs, ((0, 2 * B_half - B), (0, 0)))
    obs_pad = obs_pad.astype(compute_dtype)
    x_t = jnp.concatenate([obs_pad[:B_half].T, obs_pad[B_half:].T], axis=0)  # (2*d_in, B/2)

    w1p_t = _block_diag2(w1).T.astype(compute_dtype)   # (2*h1, 2*d_in)
    w2p_t = _block_diag2(w2).T.astype(compute_dtype)   # (2*h2, 2*h1)
    w3p_t = _block_diag2(w3).T.astype(compute_dtype)   # (2,    2*h2)
    b1c = jnp.concatenate([b1, b1], axis=-1).T.astype(jnp.float32)  # (2*h1, 1)
    b2c = jnp.concatenate([b2, b2], axis=-1).T.astype(jnp.float32)  # (2*h2, 1)
    b3c = b3.reshape(1, 1).astype(jnp.float32)                      # (1, 1)

    # ---- batch tiling ----------------------------------------------------------------
    # Packed-column tile: multiple of 128 lanes; big (>=2048) to amortize the ~0.35us
    # per-step overhead; capped so the grid has >=2 steps when possible (v7x megacore).
    tbp_target = _round_up(max(block_batch // 2, 128), 128)
    tbp_cap = _round_up(pl.cdiv(B_half, 2), 128)
    tbp = max(128, min(tbp_target, tbp_cap))
    num_tiles = pl.cdiv(B_half, tbp)

    def _resident(a):
        # Full-array block, constant index_map: fetched once, stays resident in VMEM.
        return pl.BlockSpec(a.shape, lambda i: (0,) * a.ndim)

    grid_spec = pltpu.PrefetchScalarGridSpec(
        num_scalar_prefetch=0,
        grid=(num_tiles,),
        in_specs=[
            pl.BlockSpec((2 * d_in, tbp), lambda i: (0, i)),   # streamed obs tile (lane-dense)
            _resident(w1p_t), _resident(b1c),
            _resident(w2p_t), _resident(b2c),
            _resident(w3p_t), _resident(b3c),
        ],
        out_specs=pl.BlockSpec((2, tbp), lambda i: (0, i)),    # lane-dense output slab
    )

    flops = 2 * B * (d_in * h1 + h1 * h2 + h2)
    transcendentals = B * (h1 + h2)
    bytes_accessed = (
        x_t.size * x_t.dtype.itemsize
        + sum(int(p.size) * p.dtype.itemsize for p in (w1p_t, b1c, w2p_t, b2c, w3p_t, b3c))
        + 2 * B_half * 4
    )

    out = pl.pallas_call(
        functools.partial(mlp_critic_kernel, tanh_dtype=tanh_dtype),
        out_shape=jax.ShapeDtypeStruct((2, B_half), jnp.float32),
        grid_spec=grid_spec,
        compiler_params=pltpu.CompilerParams(
            dimension_semantics=("parallel",),   # batch tiles independent -> megacore shard
        ),
        cost_estimate=pl.CostEstimate(
            flops=int(flops),
            transcendentals=int(transcendentals),
            bytes_accessed=int(bytes_accessed),
        ),
    )(x_t, w1p_t, b1c, w2p_t, b2c, w3p_t, b3c)

    # (2, B/2) row-major flatten == original batch order; drop the odd-B zero pad.
    # torch.squeeze(..., -1) semantics: result shape (B,).
    return out.reshape(2 * B_half)[:B]


def init_params(key, layer_sizes):
    """Deterministic Linear-style init: W ~ U(-k, k), b ~ U(-k, k), k = 1/sqrt(fan_in)."""
    params = []
    for d_in, d_out in zip(layer_sizes[:-1], layer_sizes[1:]):
        key, kw, kb = jax.random.split(key, 3)
        bound = 1.0 / jnp.sqrt(jnp.float32(d_in))
        w = jax.random.uniform(kw, (d_in, d_out), jnp.float32, -bound, bound)
        b = jax.random.uniform(kb, (1, d_out), jnp.float32, -bound, bound)
        params.extend([w, b])
    return tuple(params)


def reference_forward(obs, params):
    w1, b1, w2, b2, w3, b3 = params
    hp = jax.lax.Precision.HIGHEST
    h = jnp.tanh(jnp.dot(obs, w1, precision=hp) + b1)
    h = jnp.tanh(jnp.dot(h, w2, precision=hp) + b2)
    v = jnp.dot(h, w3, precision=hp) + b3
    return jnp.squeeze(v, axis=-1)


if __name__ == "__main__":
    layer_sizes = [16, 64, 64, 1]   # obs_dim=16, two hidden layers of 64, scalar value
    batch = 300                     # odd-ish batch: exercises zero-pad, 2 grid steps,
                                    # boundary-lane masking and megacore sharding.

    key = jax.random.PRNGKey(0)
    key, k_obs = jax.random.split(key)
    obs = jax.random.normal(k_obs, (batch, layer_sizes[0]), dtype=jnp.float32)
    params = init_params(key, layer_sizes)
    ref = reference_forward(obs, params)

    # Full-precision path (all chips): tight correctness check.
    values_f32 = jax.block_until_ready(
        mlp_critic_forward(obs, params, compute_dtype=jnp.float32, tanh_dtype=jnp.float32)
    )
    assert values_f32.shape == (batch,), values_f32.shape
    assert jnp.allclose(values_f32, ref, atol=1e-4, rtol=1e-4), (values_f32, ref)

    # Default fast path: bf16 MXU inputs everywhere, chip-gated tanh dtype, f32 accumulation.
    values = jax.block_until_ready(mlp_critic_forward(obs, params))
    assert values.shape == (batch,), values.shape
    assert jnp.allclose(values, ref, atol=5e-2, rtol=5e-2), (values, ref)

    print("KERNEL_OK")
</pallas_src>

<mosaic_0001>
module attributes {stable_mosaic.version = 11 : i64} {
  func.func @mlp_critic_kernel(%arg0: i32, %arg1: memref<32x128xf32, #tpu.memory_space<vmem>>, %arg2: memref<128x32xf32, #tpu.memory_space<vmem>>, %arg3: memref<128x1xf32, #tpu.memory_space<vmem>>, %arg4: memref<128x128xf32, #tpu.memory_space<vmem>>, %arg5: memref<128x1xf32, #tpu.memory_space<vmem>>, %arg6: memref<2x128xf32, #tpu.memory_space<vmem>>, %arg7: memref<1x1xf32, #tpu.memory_space<vmem>>, %arg8: memref<2x128xf32, #tpu.memory_space<vmem>>) attributes {dimension_semantics = [#tpu.dimension_semantics<parallel>], iteration_bounds = array<i64: 2>, scalar_prefetch = 0 : i64, scratch_operands = 0 : i64, tpu.core_type = #tpu.core_type<tc>, window_params = [{transform_indices = @transform_0, window_bounds = array<i64: 32, 128>}, {pipeline_mode = #tpu.pipeline_mode<synchronous>, transform_indices = @transform_1, window_bounds = array<i64: 128, 32>}, {pipeline_mode = #tpu.pipeline_mode<synchronous>, transform_indices = @transform_2, window_bounds = array<i64: 128, 1>}, {pipeline_mode = #tpu.pipeline_mode<synchronous>, transform_indices = @transform_3, window_bounds = array<i64: 128, 128>}, {pipeline_mode = #tpu.pipeline_mode<synchronous>, transform_indices = @transform_4, window_bounds = array<i64: 128, 1>}, {pipeline_mode = #tpu.pipeline_mode<synchronous>, transform_indices = @transform_5, window_bounds = array<i64: 2, 128>}, {pipeline_mode = #tpu.pipeline_mode<synchronous>, transform_indices = @transform_6, window_bounds = array<i64: 1, 1>}, {transform_indices = @transform_7, window_bounds = array<i64: 2, 128>}]} {
    %c0 = arith.constant 0 : index
    %c0_0 = arith.constant 0 : index
    %0 = vector.load %arg2[%c0, %c0_0] : memref<128x32xf32, #tpu.memory_space<vmem>>, vector<128x32xf32>
    %c0_1 = arith.constant 0 : index
    %c0_2 = arith.constant 0 : index
    %1 = vector.load %arg1[%c0_1, %c0_2] : memref<32x128xf32, #tpu.memory_space<vmem>>, vector<32x128xf32>
    %cst = arith.constant dense<0.000000e+00> : vector<128x128xf32>
    %2 = tpu.matmul %0, %1, %cst {dimension_numbers = #tpu.dot_dimension_numbers<[1], [0], [0], [1], [0, 0, 1, 1], [], []>} : vector<128x32xf32>, vector<32x128xf32>, vector<128x128xf32> -> vector<128x128xf32>
    %c0_3 = arith.constant 0 : index
    %c0_4 = arith.constant 0 : index
    %3 = vector.load %arg3[%c0_3, %c0_4] : memref<128x1xf32, #tpu.memory_space<vmem>>, vector<128x1xf32>
    %4 = vector.broadcast %3 : vector<128x1xf32> to vector<128x128xf32>
    %5 = arith.addf %2, %4 : vector<128x128xf32>
    %6 = math.tanh %5 : vector<128x128xf32>
    %c0_5 = arith.constant 0 : index
    %c0_6 = arith.constant 0 : index
    %7 = vector.load %arg4[%c0_5, %c0_6] : memref<128x128xf32, #tpu.memory_space<vmem>>, vector<128x128xf32>
    %cst_7 = arith.constant dense<0.000000e+00> : vector<128x128xf32>
    %8 = tpu.matmul %7, %6, %cst_7 {dimension_numbers = #tpu.dot_dimension_numbers<[1], [0], [0], [1], [0, 0, 1, 1], [], []>} : vector<128x128xf32>, vector<128x128xf32>, vector<128x128xf32> -> vector<128x128xf32>
    %c0_8 = arith.constant 0 : index
    %c0_9 = arith.constant 0 : index
    %9 = vector.load %arg5[%c0_8, %c0_9] : memref<128x1xf32, #tpu.memory_space<vmem>>, vector<128x1xf32>
    %10 = vector.broadcast %9 : vector<128x1xf32> to vector<128x128xf32>
    %11 = arith.addf %8, %10 : vector<128x128xf32>
    %12 = math.tanh %11 : vector<128x128xf32>
    %c0_10 = arith.constant 0 : index
    %c0_11 = arith.constant 0 : index
    %13 = vector.load %arg6[%c0_10, %c0_11] : memref<2x128xf32, #tpu.memory_space<vmem>>, vector<2x128xf32>
    %cst_12 = arith.constant dense<0.000000e+00> : vector<2x128xf32>
    %14 = tpu.matmul %13, %12, %cst_12 {dimension_numbers = #tpu.dot_dimension_numbers<[1], [0], [0], [1], [0, 0, 1, 1], [], []>} : vector<2x128xf32>, vector<128x128xf32>, vector<2x128xf32> -> vector<2x128xf32>
    %c0_13 = arith.constant 0 : index
    %c0_14 = arith.constant 0 : index
    %15 = vector.load %arg7[%c0_13, %c0_14] : memref<1x1xf32, #tpu.memory_space<vmem>>, vector<1x1xf32>
    %16 = vector.broadcast %15 : vector<1x1xf32> to vector<2x128xf32>
    %17 = arith.addf %14, %16 : vector<2x128xf32>
    %c0_15 = arith.constant 0 : index
    %c0_16 = arith.constant 0 : index
    %18 = vector.load %arg8[%c0_15, %c0_16] : memref<2x128xf32, #tpu.memory_space<vmem>>, vector<2x128xf32>
    tpu.vector_store %arg8[%c0_15, %c0_16], %17 {strides = array<i32>} : memref<2x128xf32, #tpu.memory_space<vmem>>, vector<2x128xf32>,
    return
  }
  func.func @transform_0(%arg0: i32) -> (i32, i32) {
    %c0_i32 = arith.constant 0 : i32
    %c0_i32_0 = arith.constant 0 : i32
    return %c0_i32, %arg0 : i32, i32
  }
  func.func @transform_1(%arg0: i32) -> (i32, i32) {
    %c0_i32 = arith.constant 0 : i32
    %c0_i32_0 = arith.constant 0 : i32
    %c0_i32_1 = arith.constant 0 : i32
    return %c0_i32, %c0_i32_0 : i32, i32
  }
  func.func @transform_2(%arg0: i32) -> (i32, i32) {
    %c0_i32 = arith.constant 0 : i32
    %c0_i32_0 = arith.constant 0 : i32
    %c0_i32_1 = arith.constant 0 : i32
    return %c0_i32, %c0_i32_0 : i32, i32
  }
  func.func @transform_3(%arg0: i32) -> (i32, i32) {
    %c0_i32 = arith.constant 0 : i32
    %c0_i32_0 = arith.constant 0 : i32
    %c0_i32_1 = arith.constant 0 : i32
    return %c0_i32, %c0_i32_0 : i32, i32
  }
  func.func @transform_4(%arg0: i32) -> (i32, i32) {
    %c0_i32 = arith.constant 0 : i32
    %c0_i32_0 = arith.constant 0 : i32
    %c0_i32_1 = arith.constant 0 : i32
    return %c0_i32, %c0_i32_0 : i32, i32
  }
  func.func @transform_5(%arg0: i32) -> (i32, i32) {
    %c0_i32 = arith.constant 0 : i32
    %c0_i32_0 = arith.constant 0 : i32
    %c0_i32_1 = arith.constant 0 : i32
    return %c0_i32, %c0_i32_0 : i32, i32
  }
  func.func @transform_6(%arg0: i32) -> (i32, i32) {
    %c0_i32 = arith.constant 0 : i32
    %c0_i32_0 = arith.constant 0 : i32
    %c0_i32_1 = arith.constant 0 : i32
    return %c0_i32, %c0_i32_0 : i32, i32
  }
  func.func @transform_7(%arg0: i32) -> (i32, i32) {
    %c0_i32 = arith.constant 0 : i32
    %c0_i32_0 = arith.constant 0 : i32
    return %c0_i32, %arg0 : i32, i32
  }
}

</mosaic_0001>

<bundles_post_ra>
// kernel: tpu_custom_call.1
= control target key start
LH: loop header
LB: loop body
LE: loop exit
PB: predicated region body
PF: predicated region fallthrough
CT: control target
= control target key end

     0   :  { %s1873_s0 = inlined_call_operand.vmem [shape: f32[32,150], index: 0, kind: input, shape index: {}]   ;;  %s1874_s1 = inlined_call_operand.vmem [shape: f32[128,32], index: 1, kind: input, shape index: {}]   ;;  %s1875_s2 = inlined_call_operand.vmem [shape: f32[128,1], index: 2, kind: input, shape index: {}]   ;;  %s1876_s3 = inlined_call_operand.vmem [shape: f32[128,128], index: 3, kind: input, shape index: {}]   ;;  %s1877_s4 = inlined_call_operand.vmem [shape: f32[128,1], index: 4, kind: input, shape index: {}]   ;;  %s1878_s5 = inlined_call_operand.vmem [shape: f32[2,128], index: 5, kind: input, shape index: {}]   ;;  %s1879_s6 = inlined_call_operand.<no memory space> [shape: f32[1,1], index: 6, kind: input, shape index: {}]   ;;  %s1880_s7 = inlined_call_operand.hbm [shape: f32[2,150], index: 7, kind: output, shape index: {}]  }
   0x1   :  { %v12_v0 = vstv %s1879_s6 }
   0x2   :  { %13 = vst [vmem:[#allocation2] sm:$0x1] %v12_v0 }
   0x3   :  { %14 = vsyncpa [#allocation5], 0 }
   0x4   :  { %16 = vsyncpa [#allocation5 + $0x1], 0  ;;  %s1524_s26 = smov 0   ;;  %s1526_s27 = smov 0  }
   0x5   :  { %s1528_s28 = smov 0   ;;  %s1530_s29 = smov 0  }
   0x6 LB: > { %s1085_s6 = sadd.s32 4294967295, %s1475_s29   ;;  %s1086_s30 = sadd.s32 4294967294, %s1475_s29   ;;  %s1475_s29 = sphi %s1530_s29, %s1886_s29   ;;  %s1471_s28 = sphi %s1528_s28, %s1885_s28   ;;  %s1467_s27 = sphi %s1526_s27, %s1884_s27   ;;  %s1463_s26 = sphi %s1524_s26, %s1883_s26  }
   0x7   : > { %s1547_s8 = sadd.s32 1, %s1475_s29   ;;  %s29_s9 = sadd.s32 1, %s1471_s28 }
   0x8   : > { %s26_s10 = ssub.s32 %s1475_s29, %s1547_s8  ;;  %p36_p0 = scmp.ne.s32.totalorder %s1471_s28, %s1467_s27 }
   0x9   : > { %p27_p1 = scmp.eq.s32.totalorder %s26_s10, 0  ;;  %p37_p2 = scmp.eq.s32.totalorder %s1475_s29, 0 }
   0xa   : > { %p192_p3 = scmp.eq.s32.totalorder %s1085_s6, 1  ;;  %p197_p4 = scmp.ne.s32.totalorder %s1467_s27, %s1463_s26 }
   0xb   : > { %s1560_s11 = scalar_select %p27_p1, %s1471_s28, %s29_s9  }
   0xc   : > { %p38_p5 = por %p37_p2, %p36_p0  ;;  %p1562_p6 = por %p192_p3, %p36_p0 }
   0xd   : > { %p198_p7 = scmp.eq.s32.totalorder %s1086_s30, 1  ;;  %p1088_p9 = scmp.ge.s32.totalorder %s1475_s29, 2 }
   0xf   : > { %p1566_p8 = por %p198_p7, %p197_p4  ;;  %232 = sbr.rel (%p1088_p9) target bundleno = 26 (0x1a), region = 40 }
  0x14   : > { %235 = sbr.rel (!%p38_p5) target bundleno = 26 (0x1a), region = 44  ;;  %s237_s14 = sand.u32 (%p38_p5), 1, %s1471_s28  }
  0x15   : > { %s1090_s15 = sshll.u32 (%p38_p5), %s1475_s29, 3  ;;  %s1089_s16 = sshll.u32 (%p38_p5), %s237_s14, 5 }
  0x16   : > { %s241_s19 = scalar_lea.vmem (%p38_p5), %s1873_s0, %s1090_s15  ;;  %s239_s20 = scalar_lea.vmem (%p38_p5), [#allocation3], %s1089_s16 }
  0x17   : > { %v276_v1 = vld [vmem:[%s241_s19] sm:$0xff] (%p38_p5)  ;;  %v278_v2 = vld [vmem:[%s241_s19 + $0x10] sm:$0xff] (%p38_p5) }
  0x18   : > { %v280_v3 = vld [vmem:[%s241_s19 + $0x20] sm:$0xff] (%p38_p5)  ;;  %277 = vst [vmem:[%s239_s20] sm:$0xff] (%p38_p5), %v276_v1  ;;  %279 = vst [vmem:[%s239_s20 + $0x8] sm:$0xff] (%p38_p5), %v278_v2  ;;  %v282_v4 = vld [vmem:[%s241_s19 + $0x30] sm:$0xff] (%p38_p5) }
  0x19   : > { %281 = vst [vmem:[%s239_s20 + $0x10] sm:$0xff] %v280_v3  ;;  %283 = vst [vmem:[%s239_s20 + $0x18] sm:$0xff] %v282_v4 }
  0x1a PF: > { %p1091_p10 = scmp.ge.s32.totalorder %s1475_s29, 1  ;;  %p288_p11 = scmp.lt.s32.totalorder %s1475_s29, 3 }
  0x1c   : > { %p289_p12 = pnand %p1091_p10, %p288_p11 }
  0x1d   : > { %s1581_s21 = sand.u32 (!%p289_p12), 1, %s1467_s27   ;;  %s1112_s14 = sshll.u32 (!%p289_p12), %s1085_s6, 5 }
  0x1e   : > { %292 = sbr.rel (%p289_p12) target bundleno = 790 (0x316), region = 82  ;;  %s1092_s24 = sshll.u32 (!%p289_p12), %s1581_s21, 5 }
  0x1f   : > { %s297_s25 = scalar_lea.vmem (!%p289_p12), [#allocation3], %s1092_s24  ;;  %s1093_s10 = sshll.u32 (!%p289_p12), %s1581_s21, 1 }
  0x20   : > { %s325_s15 = scalar_lea.vmem (!%p289_p12), [#allocation4], %s1093_s10  ;;  %s1836_s19 = scalar_lea.hbm (!%p289_p12), %s1880_s7, %s1112_s14 }
  0x21   : > { %s1021_s16 = sshll.u32 (!%p289_p12), %s325_s15, 4  ;;  %s1008_s20 = scalar_lea.sflag (!%p289_p12), [#allocation5], %s1581_s21  ;;  %s1022_s16 = int_to_ptr.vmem [resolvable:$true] %s1021_s16 }
  0x22   : > { %s1415_s22 = scalar_lea.vmem (!%p289_p12), %s1022_s16, 32  ;;  %s1480_s6 = smov (!%p289_p12), [#allocation4]  }
  0x23   : > { %v326_v5 = vld [vmem:[%s1874_s1] sm:$0xff]  ;;  %vm442_vm0 = vcmask 261120   ;;  %v1477_v6 = vmov 0   ;;  %v344_v8 = vld [vmem:[%s297_s25 + $0x10] sm:$0xff]  ;;  %v343_v9 = vld [vmem:[%s297_s25 + $0x8] sm:$0xff]  ;;  %vm1479_vm1 = vmmov 0   ;;  %p1416_p13 = scmp.ne.s32.totalorder %s1022_s16, %s1415_s22 }
  0x24   : > { %1192 = vmatprep.mubr.msk.f32.mxu0 %vm442_vm0, %v326_v5  ;;  %1349 = vset.pattern.permute.xlu0 %v1477_v6  ;;  %v345_v7 = vld [vmem:[%s297_s25 + $0x18] sm:$0xff]  ;;  %v342_v11 = vld [vmem:[%s297_s25] sm:$0xff]  ;;  %v360_v13 = vld [vmem:[%s1875_s2 + $0x70] sm:$0xff]  ;;  %s1419_s23 = sshll.u32 %s1480_s6, 4  ;;  %s1420_s23 = int_to_ptr.vmem [resolvable:$false] %s1419_s23 }
  0x25   : > { %1350 = vset.pattern.permute.xlu1 %v1477_v6  ;;  %1184 = vmatprep.subr.mxu0 %v345_v7  ;;  %v361_v10 = vld [vmem:[%s1875_s2 + $0x78] sm:$0xff]  ;;  %v359_v12 = vld [vmem:[%s1875_s2 + $0x68] sm:$0xff]  ;;  %v358_v15 = vld [vmem:[%s1875_s2 + $0x60] sm:$0xff]  ;;  %p1417_p0 = pnand %p1416_p13, %p1562_p6  ;;  %s1421_s24 = scalar_lea.vmem %s1420_s23, 64 }
  0x26   : > { %1185 = vmatpush3.msra.mxu0 %v345_v7  ;;  %439 = vperm.xlu0 %1349, %v361_v10   ;;  %v327_v14 = vld [vmem:[%s1874_s1 + $0x8] sm:$0xff]  ;;  %v328_v16 = vld [vmem:[%s1874_s1 + $0x10] sm:$0xff]  ;;  %v357_v17 = vld [vmem:[%s1875_s2 + $0x58] sm:$0xff]  ;;  %p1422_p2 = scmp.lt.s32.totalorder %s1022_s16, %s1420_s23  ;;  %p1423_p3 = scmp.lt.s32.totalorder %s1421_s24, %s1415_s22 }
  0x27   : > { %1186 = vmatprep.subr.mxu0 %v344_v8  ;;  %429 = vperm.xlu1 %1350, %v359_v12   ;;  %v329_v18 = vld [vmem:[%s1874_s1 + $0x18] sm:$0xff]  ;;  %v356_v19 = vld [vmem:[%s1875_s2 + $0x50] sm:$0xff]  ;;  %v330_v20 = vld [vmem:[%s1874_s1 + $0x20] sm:$0xff]  ;;  %p1418_p1 = pneg %p1417_p0 }
  0x28   : > { %1187 = vmatpush3.msra.mxu0 %v344_v8  ;;  %v355_v21 = vld [vmem:[%s1875_s2 + $0x48] sm:$0xff]  ;;  %v354_v23 = vld [vmem:[%s1875_s2 + $0x40] sm:$0xff]  ;;  %v332_v24 = vld [vmem:[%s1874_s1 + $0x30] sm:$0xff]  ;;  %p1424_p4 = por %p1423_p3, %p1422_p2 }
  0x29   : > { %1188 = vmatprep.subr.mxu0 %v343_v9  ;;  %v331_v22 = vld [vmem:[%s1874_s1 + $0x28] sm:$0xff]  ;;  %v353_v25 = vld [vmem:[%s1875_s2 + $0x38] sm:$0xff]  ;;  %v352_v27 = vld [vmem:[%s1875_s2 + $0x30] sm:$0xff] }
  0x2a   : > { %1189 = vmatpush3.msra.mxu0 %v343_v9  ;;  %434 = vperm.xlu0 %1349, %v360_v13   ;;  %v333_v26 = vld [vmem:[%s1874_s1 + $0x38] sm:$0xff]  ;;  %v334_v28 = vld [vmem:[%s1874_s1 + $0x40] sm:$0xff]  ;;  %v351_v29 = vld [vmem:[%s1875_s2 + $0x28] sm:$0xff]  ;;  %p1425_p5 = pnand %p1424_p4, %p1418_p1 }
  0x2b   : > { %1190 = vmatprep.subr.mxu0 %v342_v11  ;;  %424 = vperm.xlu1 %1350, %v358_v15   ;;  %v335_v30 = vld [vmem:[%s1874_s1 + $0x48] sm:$0xff]  ;;  %v350_v31 = vld [vmem:[%s1875_s2 + $0x20] sm:$0xff]  ;;  %v336_v32 = vld [vmem:[%s1874_s1 + $0x50] sm:$0xff] }
  0x2c   : > { %1191 = vmatpush3.msra.mxu0 %v342_v11  ;;  %v349_v33 = vld [vmem:[%s1875_s2 + $0x18] sm:$0xff]  ;;  %v348_v35 = vld [vmem:[%s1875_s2 + $0x10] sm:$0xff]  ;;  %v338_v36 = vld [vmem:[%s1874_s1 + $0x60] sm:$0xff] }
  0x2d   : > { %1193 = vmatmul.mubr.msk.f32.vlgmr.msra.gmra.mxu0 %vm442_vm0, %v327_v14  ;;  %v337_v34 = vld [vmem:[%s1874_s1 + $0x58] sm:$0xff]  ;;  %v347_v37 = vld [vmem:[%s1875_s2 + $0x8] sm:$0xff]  ;;  %v346_v39 = vld [vmem:[%s1875_s2] sm:$0xff] }
  0x2e   : > { %1195 = vmatprep.mubr.msk.f32.mxu0 %vm442_vm0, %v328_v16  ;;  %419 = vperm.xlu0 %1349, %v357_v17   ;;  %v339_v38 = vld [vmem:[%s1874_s1 + $0x68] sm:$0xff]  ;;  %v340_v40 = vld [vmem:[%s1874_s1 + $0x70] sm:$0xff]  ;;  %v683_v41 = vld [vmem:[%s1877_s4 + $0x78] sm:$0xff] }
  0x2f   : > { %414 = vperm.xlu1 %1350, %v356_v19   ;;  %v341_v42 = vld [vmem:[%s1874_s1 + $0x78] sm:$0xff]  ;;  %v682_v43 = vld [vmem:[%s1877_s4 + $0x70] sm:$0xff]  ;;  %v681_v44 = vld [vmem:[%s1877_s4 + $0x68] sm:$0xff] }
  0x30   : > { %v680_v45 = vld [vmem:[%s1877_s4 + $0x60] sm:$0xff]  ;;  %v679_v46 = vld [vmem:[%s1877_s4 + $0x58] sm:$0xff]  ;;  %v678_v47 = vld [vmem:[%s1877_s4 + $0x50] sm:$0xff] }
  0x31   : > { %1196 = vmatmul.mubr.msk.f32.gmra.mxu0 %vm442_vm0, %v329_v18  ;;  %v677_v48 = vld [vmem:[%s1877_s4 + $0x48] sm:$0xff]  ;;  %v676_v49 = vld [vmem:[%s1877_s4 + $0x40] sm:$0xff]  ;;  %v675_v50 = vld [vmem:[%s1877_s4 + $0x38] sm:$0xff] }
  0x32   : > { %1198 = vmatprep.mubr.msk.f32.mxu0 %vm442_vm0, %v330_v20  ;;  %409 = vperm.xlu0 %1349, %v355_v21   ;;  %v674_v51 = vld [vmem:[%s1877_s4 + $0x30] sm:$0xff]  ;;  %v673_v52 = vld [vmem:[%s1877_s4 + $0x28] sm:$0xff]  ;;  %v672_v53 = vld [vmem:[%s1877_s4 + $0x20] sm:$0xff] }
  0x33   : > { %404 = vperm.xlu1 %1350, %v354_v23   ;;  %v671_v54 = vld [vmem:[%s1877_s4 + $0x18] sm:$0xff]  ;;  %v670_v55 = vld [vmem:[%s1877_s4 + $0x10] sm:$0xff]  ;;  %v669_v56 = vld [vmem:[%s1877_s4 + $0x8] sm:$0xff] }
  0x34   : > { %v668_v57 = vld [vmem:[%s1877_s4] sm:$0xff] }
  0x35   : > { %1199 = vmatmul.mubr.msk.f32.gmra.mxu0 %vm442_vm0, %v331_v22  ;;  %v1110_v58 = vld [vmem:[#allocation2] ss:$0 sm:$0xff] }
  0x36   : > { %1201 = vmatprep.mubr.msk.f32.mxu0 %vm442_vm0, %v332_v24  ;;  %399 = vperm.xlu0 %1349, %v353_v25   ;;  %v652_v59 = vld [vmem:[%s1876_s3] sm:$0xff] }
  0x37   : > { %394 = vperm.xlu1 %1350, %v352_v27   ;;  %1248 = vmatprep.mubr.f32.mxu1 %v652_v59 }
  0x39   : > { %1202 = vmatmul.mubr.msk.f32.gmra.mxu0 %vm442_vm0, %v333_v26 }
  0x3a   : > { %1204 = vmatprep.mubr.msk.f32.mxu0 %vm442_vm0, %v334_v28  ;;  %389 = vperm.xlu0 %1349, %v351_v29  }
  0x3b   : > { %384 = vperm.xlu1 %1350, %v350_v31  }
  0x3d   : > { %1205 = vmatmul.mubr.msk.f32.gmra.mxu0 %vm442_vm0, %v335_v30 }
  0x3e   : > { %1207 = vmatprep.mubr.msk.f32.mxu0 %vm442_vm0, %v336_v32  ;;  %379 = vperm.xlu0 %1349, %v349_v33  }
  0x3f   : > { %374 = vperm.xlu1 %1350, %v348_v35  }
  0x41   : > { %1208 = vmatmul.mubr.msk.f32.gmra.mxu0 %vm442_vm0, %v337_v34 }
  0x42   : > { %1210 = vmatprep.mubr.msk.f32.mxu0 %vm442_vm0, %v338_v36  ;;  %369 = vperm.xlu0 %1349, %v347_v37  }
  0x43   : > { %364 = vperm.xlu1 %1350, %v346_v39  }
  0x45   : > { %1211 = vmatmul.mubr.msk.f32.gmra.mxu0 %vm442_vm0, %v339_v38 }
  0x46   : > { %1213 = vmatprep.mubr.msk.f32.mxu0 %vm442_vm0, %v340_v40  ;;  %761 = vperm.xlu0 %1349, %v683_v41  }
  0x47   : > { %756 = vperm.xlu1 %1350, %v682_v43  }
  0x49   : > { %1214 = vmatmul.mubr.msk.f32.gmra.mxu0 %vm442_vm0, %v341_v42 }
  0x4a   : > { %751 = vperm.xlu0 %1349, %v681_v44  }
  0x4b   : > { %746 = vperm.xlu1 %1350, %v680_v45  }
  0x4e   : > { %741 = vperm.xlu0 %1349, %v679_v46  }
  0x4f   : > { %736 = vperm.xlu1 %1350, %v678_v47  }
  0x52   : > { %731 = vperm.xlu0 %1349, %v677_v48  }
  0x53   : > { %726 = vperm.xlu1 %1350, %v676_v49  }
  0x56   : > { %721 = vperm.xlu0 %1349, %v675_v50  }
  0x57   : > { %716 = vperm.xlu1 %1350, %v674_v51  }
  0x5a   : > { %711 = vperm.xlu0 %1349, %v673_v52  }
  0x5b   : > { %706 = vperm.xlu1 %1350, %v672_v53  }
  0x5e   : > { %701 = vperm.xlu0 %1349, %v671_v54  }
  0x5f   : > { %696 = vperm.xlu1 %1350, %v670_v55  }
  0x62   : > { %691 = vperm.xlu0 %1349, %v669_v56  }
  0x63   : > { %686 = vperm.xlu1 %1350, %v668_v57  }
  0x66   : > { %933 = vperm.xlu0 %1349, %v1110_v58  }
  0xa1   : > { %v440_v2 = vpop.permute.xlu0 %439 }
  0xa2   : > { %v430_v4 = vpop.permute.xlu1 %429 }
  0xa5   : > { %v435_v7 = vpop.permute.xlu0 %434 }
  0xa6   : > { %v425_v9 = vpop.permute.xlu1 %424 }
  0xa9   : > { %v420_v12 = vpop.permute.xlu0 %419 }
  0xaa   : > { %v415_v14 = vpop.permute.xlu1 %414 }
  0xad   : > { %v410_v18 = vpop.permute.xlu0 %409 }
  0xae   : > { %v405_v22 = vpop.permute.xlu1 %404 }
  0xb1   : > { %v400_v25 = vpop.permute.xlu0 %399 }
  0xb2   : > { %v395_v27 = vpop.permute.xlu1 %394 }
  0xb5   : > { %v390_v30 = vpop.permute.xlu0 %389 }
  0xb6   : > { %v385_v33 = vpop.permute.xlu1 %384 }
  0xb9   : > { %v380_v38 = vpop.permute.xlu0 %379 }
  0xba   : > { %v375_v41 = vpop.permute.xlu1 %374 }
  0xbd   : > { %v370_v46 = vpop.permute.xlu0 %369 }
  0xbe   : > { %v365_v49 = vpop.permute.xlu1 %364 }
  0xed   : > { %v1747_v60 = vpop.f32.mrf.mxu0 }
  0xee   : > { %v563_v47 = vadd.f32 %v1747_v60, %v370_v46  ;;  %v653_v60 = vld [vmem:[%s1876_s3 + $0x8] sm:$0xff] }
  0xef   : > { %v1749_v61 = vpop.f32.mrf.mxu0 }
  0xf0   : > { %v558_v50 = vadd.f32 %v1749_v61, %v365_v49  ;;  %v654_v61 = vld [vmem:[%s1876_s3 + $0x10] sm:$0xff] }
  0xf1   : > { %v1197_v62 = vpop.f32.mrf.mxu0 }
  0xf2   : > { %v573_v42 = vadd.f32 %v1197_v62, %v380_v38  ;;  %v655_v62 = vld [vmem:[%s1876_s3 + $0x18] sm:$0xff] }
  0xf3   : > { %v1751_v63 = vpop.f32.mrf.mxu0 }
  0xf4   : > { %v568_v44 = vadd.f32 %v1751_v63, %v375_v41  ;;  %v656_v63 = vld [vmem:[%s1876_s3 + $0x20] sm:$0xff] }
  0xf5   : > { %v1200_v0 = vpop.f32.mrf.mxu0 }
  0xf6   : > { %v583_v36 = vadd.f32 %v1200_v0, %v390_v30  ;;  %v657_v0 = vld [vmem:[%s1876_s3 + $0x28] sm:$0xff] }
  0xf7   : > { %v577_v1 = vpop.f32.mrf.mxu0 }
  0xf8   : > { %v578_v39 = vadd.f32 %v577_v1, %v385_v33  ;;  %v658_v1 = vld [vmem:[%s1876_s3 + $0x30] sm:$0xff] }
  0xf9   : > { %v1203_v3 = vpop.f32.mrf.mxu0 }
  0xfa   : > { %v593_v31 = vadd.f32 %v1203_v3, %v400_v25  ;;  %v660_v3 = vld [vmem:[%s1876_s3 + $0x40] sm:$0xff] }
  0xfb   : > { %v587_v5 = vpop.f32.mrf.mxu0 }
  0xfc   : > { %v588_v34 = vadd.f32 %v587_v5, %v395_v27  ;;  %v662_v5 = vld [vmem:[%s1876_s3 + $0x50] sm:$0xff] }
  0xfd   : > { %v1206_v6 = vpop.f32.mrf.mxu0 }
  0xfe   : > { %v603_v28 = vadd.f32 %v1206_v6, %v410_v18  ;;  %v663_v6 = vld [vmem:[%s1876_s3 + $0x58] sm:$0xff]  ;;  %v762_v18 = vpop.permute.xlu0 %761 }
  0xff   : > { %v597_v8 = vpop.f32.mrf.mxu0 }
 0x100   : > { %v598_v29 = vadd.f32 %v597_v8, %v405_v22  ;;  %v665_v8 = vld [vmem:[%s1876_s3 + $0x68] sm:$0xff] }
 0x101   : > { %v1209_v10 = vpop.f32.mrf.mxu0 }
 0x102   : > { %v613_v24 = vadd.f32 %v1209_v10, %v420_v12  ;;  %v667_v10 = vld [vmem:[%s1876_s3 + $0x78] sm:$0xff] }
 0x103   : > { %v607_v11 = vpop.f32.mrf.mxu0 }
 0x104   : > { %v608_v26 = vadd.f32 %v607_v11, %v415_v14  ;;  %v1478_v11 = vmov 0.0  }
 0x105   : > { %v1212_v13 = vpop.f32.mrf.mxu0  ;;  %1272 = vmatprep.subr.mxu0 %v1478_v11  ;;  %1304 = vmatprep.mubr.msk.f32.mxu0 %vm1479_vm1, %v1478_v11 }
 0x106   : > { %v623_v20 = vadd.f32 %v1212_v13, %v430_v4  ;;  %v661_v4 = vld [vmem:[%s1876_s3 + $0x48] sm:$0xff] }
 0x107   : > { %v617_v15 = vpop.f32.mrf.mxu0 }
 0x108   : > { %v618_v23 = vadd.f32 %v617_v15, %v425_v9  ;;  %v666_v9 = vld [vmem:[%s1876_s3 + $0x70] sm:$0xff] }
 0x109   : > { %v1215_v16 = vpop.f32.mrf.mxu0 }
 0x10a   : > { %v633_v17 = vadd.f32 %v1215_v16, %v440_v2  ;;  %v659_v2 = vld [vmem:[%s1876_s3 + $0x38] sm:$0xff] }
 0x10b   : > { %v627_v19 = vpop.f32.mrf.mxu0 }
 0x10c   : > { %1351 = vtanh.f32 %v633_v17  ;;  %v628_v21 = vadd.f32 %v627_v19, %v435_v7  ;;  %v664_v7 = vld [vmem:[%s1876_s3 + $0x60] sm:$0xff] }
 0x10e   : > { %1353 = vtanh.f32 %v628_v21 }
 0x10f   : > { %1355 = vtanh.f32 %v623_v20  ;;  %v757_v20 = vpop.permute.xlu1 %756 }
 0x110   : > { %1357 = vtanh.f32 %v618_v23  ;;  %v752_v23 = vpop.permute.xlu0 %751 }
 0x111   : > { %1359 = vtanh.f32 %v613_v24 }
 0x112   : > { %1361 = vtanh.f32 %v608_v26 }
 0x113   : > { %1363 = vtanh.f32 %v603_v28  ;;  %v747_v25 = vpop.permute.xlu1 %746 }
 0x114   : > { %1365 = vtanh.f32 %v598_v29  ;;  %v742_v28 = vpop.permute.xlu0 %741 }
 0x115   : > { %1367 = vtanh.f32 %v593_v31 }
 0x116   : > { %1369 = vtanh.f32 %v588_v34 }
 0x117   : > { %1371 = vtanh.f32 %v583_v36  ;;  %v737_v30 = vpop.permute.xlu1 %736 }
 0x118   : > { %1373 = vtanh.f32 %v578_v39  ;;  %v732_v34 = vpop.permute.xlu0 %731 }
 0x119   : > { %v1352_v32 = vpop.eup %1351  ;;  %1375 = vtanh.f32 %v573_v42 }
 0x11a   : > { %1216 = vmatprep.subr.mxu1 %v1352_v32  ;;  %1377 = vtanh.f32 %v568_v44 }
 0x11b   : > { %v1354_v35 = vpop.eup %1353  ;;  %1217 = vmatpush3.msra.mxu1 %v1352_v32  ;;  %1379 = vtanh.f32 %v563_v47  ;;  %v727_v38 = vpop.permute.xlu1 %726 }
 0x11c   : > { %1218 = vmatprep.subr.mxu1 %v1354_v35  ;;  %v1356_v37 = vpop.eup %1355  ;;  %1381 = vtanh.f32 %v558_v50  ;;  %v722_v41 = vpop.permute.xlu0 %721 }
 0x11d   : > { %1219 = vmatpush3.msra.mxu1 %v1354_v35  ;;  %v1358_v40 = vpop.eup %1357 }
 0x11e   : > { %1220 = vmatprep.subr.mxu1 %v1356_v37  ;;  %v1360_v43 = vpop.eup %1359 }
 0x11f   : > { %1221 = vmatpush3.msra.mxu1 %v1356_v37  ;;  %v1362_v45 = vpop.eup %1361 }
 0x120   : > { %1222 = vmatprep.subr.mxu1 %v1358_v40  ;;  %v1364_v48 = vpop.eup %1363  ;;  %v712_v46 = vpop.permute.xlu0 %711 }
 0x121   : > { %1223 = vmatpush3.msra.mxu1 %v1358_v40  ;;  %v1366_v51 = vpop.eup %1365 }
 0x122   : > { %1224 = vmatprep.subr.mxu1 %v1360_v43  ;;  %v1368_v52 = vpop.eup %1367 }
 0x123   : > { %1225 = vmatpush3.msra.mxu1 %v1360_v43  ;;  %v1370_v53 = vpop.eup %1369  ;;  %v717_v43 = vpop.permute.xlu1 %716 }
 0x124   : > { %1226 = vmatprep.subr.mxu1 %v1362_v45  ;;  %v1372_v54 = vpop.eup %1371 }
 0x125   : > { %1227 = vmatpush3.msra.mxu1 %v1362_v45  ;;  %v1374_v55 = vpop.eup %1373 }
 0x126   : > { %1228 = vmatprep.subr.mxu1 %v1364_v48  ;;  %v1376_v56 = vpop.eup %1375 }
 0x127   : > { %1229 = vmatpush3.msra.mxu1 %v1364_v48  ;;  %v1378_v57 = vpop.eup %1377  ;;  %v707_v49 = vpop.permute.xlu1 %706 }
 0x128   : > { %1230 = vmatprep.subr.mxu1 %v1366_v51  ;;  %v1380_v58 = vpop.eup %1379 }
 0x129   : > { %1231 = vmatpush3.msra.mxu1 %v1366_v51  ;;  %v1382_v59 = vpop.eup %1381 }
 0x12a   : > { %1232 = vmatprep.subr.mxu1 %v1368_v52 }
 0x12b   : > { %1233 = vmatpush3.msra.mxu1 %v1368_v52 }
 0x12c   : > { %1234 = vmatprep.subr.mxu1 %v1370_v53 }
 0x12d   : > { %1235 = vmatpush3.msra.mxu1 %v1370_v53 }
 0x12e   : > { %1236 = vmatprep.subr.mxu1 %v1372_v54 }
 0x12f   : > { %1237 = vmatpush3.msra.mxu1 %v1372_v54  ;;  %v702_v54 = vpop.permute.xlu0 %701 }
 0x130   : > { %1238 = vmatprep.subr.mxu1 %v1374_v55 }
 0x131   : > { %1239 = vmatpush3.msra.mxu1 %v1374_v55 }
 0x132   : > { %1240 = vmatprep.subr.mxu1 %v1376_v56 }
 0x133   : > { %1241 = vmatpush3.msra.mxu1 %v1376_v56 }
 0x134   : > { %1242 = vmatprep.subr.mxu1 %v1378_v57 }
 0x135   : > { %1243 = vmatpush3.msra.mxu1 %v1378_v57  ;;  %v697_v57 = vpop.permute.xlu1 %696 }
 0x136   : > { %1244 = vmatprep.subr.mxu1 %v1380_v58 }
 0x137   : > { %1245 = vmatpush3.msra.mxu1 %v1380_v58 }
 0x138   : > { %1246 = vmatprep.subr.mxu1 %v1382_v59 }
 0x139   : > { %1247 = vmatpush3.msra.mxu1 %v1382_v59 }
 0x13a   : > { %1249 = vmatmul.mubr.f32.vlgmr.msra.gmra.mxu1 %v653_v60 }
 0x13b   : > { %1251 = vmatprep.mubr.f32.mxu1 %v654_v61 }
 0x13e   : > { %1252 = vmatmul.mubr.f32.gmra.mxu1 %v655_v62  ;;  %v692_v62 = vpop.permute.xlu0 %691 }
 0x13f   : > { %1254 = vmatprep.mubr.f32.mxu1 %v656_v63 }
 0x142   : > { %1255 = vmatmul.mubr.f32.gmra.mxu1 %v657_v0 }
 0x143   : > { %1257 = vmatprep.mubr.f32.mxu1 %v658_v1  ;;  %v687_v1 = vpop.permute.xlu1 %686 }
 0x146   : > { %1258 = vmatmul.mubr.f32.gmra.mxu1 %v659_v2 }
 0x147   : > { %1260 = vmatprep.mubr.f32.mxu1 %v660_v3 }
 0x14a   : > { %1261 = vmatmul.mubr.f32.gmra.mxu1 %v661_v4 }
 0x14b   : > { %1263 = vmatprep.mubr.f32.mxu1 %v662_v5 }
 0x14e   : > { %1264 = vmatmul.mubr.f32.gmra.mxu1 %v663_v6 }
 0x14f   : > { %1266 = vmatprep.mubr.f32.mxu1 %v664_v7 }
 0x152   : > { %1267 = vmatmul.mubr.f32.gmra.mxu1 %v665_v8 }
 0x153   : > { %1269 = vmatprep.mubr.f32.mxu1 %v666_v9 }
 0x156   : > { %1270 = vmatmul.mubr.f32.gmra.mxu1 %v667_v10 }
 0x1fa   : > { %v1803_v12 = vpop.f32.mrf.mxu1 }
 0x1fb   : > { %v836_v63 = vadd.f32 %v1803_v12, %v692_v62  ;;  %v925_v12 = vld [vmem:[%s1878_s5] sm:$0x3] }
 0x1fc   : > { %v1805_v13 = vpop.f32.mrf.mxu1 }
 0x1fd   : > { %v831_v2 = vadd.f32 %v1805_v13, %v687_v1 }
 0x1fe   : > { %v1253_v14 = vpop.f32.mrf.mxu1 }
 0x1ff   : > { %v846_v58 = vadd.f32 %v1253_v14, %v702_v54  ;;  %v934_v14 = vpop.permute.xlu0 %933 }
 0x200   : > { %v1807_v15 = vpop.f32.mrf.mxu1 }
 0x201   : > { %v841_v60 = vadd.f32 %v1807_v15, %v697_v57 }
 0x202   : > { %v1256_v16 = vpop.f32.mrf.mxu1 }
 0x203   : > { %v856_v52 = vadd.f32 %v1256_v16, %v712_v46 }
 0x204   : > { %v850_v17 = vpop.f32.mrf.mxu1 }
 0x205   : > { %v851_v55 = vadd.f32 %v850_v17, %v707_v49 }
 0x206   : > { %v1259_v19 = vpop.f32.mrf.mxu1 }
 0x207   : > { %v866_v47 = vadd.f32 %v1259_v19, %v722_v41 }
 0x208   : > { %v860_v21 = vpop.f32.mrf.mxu1 }
 0x209   : > { %v861_v50 = vadd.f32 %v860_v21, %v717_v43 }
 0x20a   : > { %v1262_v22 = vpop.f32.mrf.mxu1 }
 0x20b   : > { %v876_v44 = vadd.f32 %v1262_v22, %v732_v34 }
 0x20c   : > { %v870_v24 = vpop.f32.mrf.mxu1 }
 0x20d   : > { %v871_v45 = vadd.f32 %v870_v24, %v727_v38 }
 0x20e   : > { %v1265_v26 = vpop.f32.mrf.mxu1 }
 0x20f   : > { %v886_v40 = vadd.f32 %v1265_v26, %v742_v28 }
 0x210   : > { %v880_v27 = vpop.f32.mrf.mxu1 }
 0x211   : > { %v881_v42 = vadd.f32 %v880_v27, %v737_v30 }
 0x212   : > { %v1268_v29 = vpop.f32.mrf.mxu1 }
 0x213   : > { %v896_v36 = vadd.f32 %v1268_v29, %v752_v23 }
 0x214   : > { %v890_v31 = vpop.f32.mrf.mxu1 }
 0x215   : > { %v891_v39 = vadd.f32 %v890_v31, %v747_v25 }
 0x216   : > { %v1271_v32 = vpop.f32.mrf.mxu1 }
 0x217   : > { %v906_v33 = vadd.f32 %v1271_v32, %v762_v18 }
 0x218   : > { %v900_v35 = vpop.f32.mrf.mxu1 }
 0x219   : > { %1383 = vtanh.f32 %v906_v33  ;;  %v901_v37 = vadd.f32 %v900_v35, %v757_v20 }
 0x21b   : > { %1385 = vtanh.f32 %v901_v37 }
 0x21c   : > { %1387 = vtanh.f32 %v896_v36 }
 0x21d   : > { %1389 = vtanh.f32 %v891_v39 }
 0x21e   : > { %1391 = vtanh.f32 %v886_v40 }
 0x21f   : > { %1393 = vtanh.f32 %v881_v42 }
 0x220   : > { %1395 = vtanh.f32 %v876_v44 }
 0x221   : > { %1397 = vtanh.f32 %v871_v45 }
 0x222   : > { %1399 = vtanh.f32 %v866_v47 }
 0x223   : > { %1401 = vtanh.f32 %v861_v50 }
 0x224   : > { %1403 = vtanh.f32 %v856_v52 }
 0x225   : > { %1405 = vtanh.f32 %v851_v55 }
 0x226   : > { %v1384_v48 = vpop.eup %1383  ;;  %1407 = vtanh.f32 %v846_v58 }
 0x227   : > { %1273 = vmatpush3.msra.mxu0 %v1384_v48  ;;  %1409 = vtanh.f32 %v841_v60 }
 0x228   : > { %v1386_v51 = vpop.eup %1385  ;;  %1274 = vmatprep.subr.mxu0 %v1478_v11  ;;  %1411 = vtanh.f32 %v836_v63 }
 0x229   : > { %1275 = vmatpush3.msra.mxu0 %v1386_v51  ;;  %v1388_v53 = vpop.eup %1387  ;;  %1413 = vtanh.f32 %v831_v2 }
 0x22a   : > { %1276 = vmatprep.subr.mxu0 %v1478_v11  ;;  %v1390_v56 = vpop.eup %1389 }
 0x22b   : > { %1277 = vmatpush3.msra.mxu0 %v1388_v53  ;;  %v1392_v59 = vpop.eup %1391 }
 0x22c   : > { %1278 = vmatprep.subr.mxu0 %v1478_v11  ;;  %v1394_v61 = vpop.eup %1393 }
 0x22d   : > { %1279 = vmatpush3.msra.mxu0 %v1390_v56  ;;  %v1396_v0 = vpop.eup %1395 }
 0x22e   : > { %1280 = vmatprep.subr.mxu0 %v1478_v11  ;;  %v1398_v3 = vpop.eup %1397 }
 0x22f   : > { %1281 = vmatpush3.msra.mxu0 %v1392_v59  ;;  %v1400_v4 = vpop.eup %1399 }
 0x230   : > { %1282 = vmatprep.subr.mxu0 %v1478_v11  ;;  %v1402_v5 = vpop.eup %1401 }
 0x231   : > { %1283 = vmatpush3.msra.mxu0 %v1394_v61  ;;  %v1404_v6 = vpop.eup %1403 }
 0x232   : > { %1284 = vmatprep.subr.mxu0 %v1478_v11  ;;  %v1406_v7 = vpop.eup %1405 }
 0x233   : > { %1285 = vmatpush3.msra.mxu0 %v1396_v0  ;;  %v1408_v8 = vpop.eup %1407 }
 0x234   : > { %1286 = vmatprep.subr.mxu0 %v1478_v11  ;;  %v1410_v9 = vpop.eup %1409 }
 0x235   : > { %1287 = vmatpush3.msra.mxu0 %v1398_v3  ;;  %v1412_v10 = vpop.eup %1411 }
 0x236   : > { %1288 = vmatprep.subr.mxu0 %v1478_v11  ;;  %v1414_v13 = vpop.eup %1413 }
 0x237   : > { %1289 = vmatpush3.msra.mxu0 %v1400_v4 }
 0x238   : > { %1290 = vmatprep.subr.mxu0 %v1478_v11 }
 0x239   : > { %1291 = vmatpush3.msra.mxu0 %v1402_v5 }
 0x23a   : > { %1292 = vmatprep.subr.mxu0 %v1478_v11 }
 0x23b   : > { %1293 = vmatpush3.msra.mxu0 %v1404_v6 }
 0x23c   : > { %1294 = vmatprep.subr.mxu0 %v1478_v11 }
 0x23d   : > { %1295 = vmatpush3.msra.mxu0 %v1406_v7 }
 0x23e   : > { %1296 = vmatprep.subr.mxu0 %v1478_v11 }
 0x23f   : > { %1297 = vmatpush3.msra.mxu0 %v1408_v8 }
 0x240   : > { %1298 = vmatprep.subr.mxu0 %v1478_v11 }
 0x241   : > { %1299 = vmatpush3.msra.mxu0 %v1410_v9 }
 0x242   : > { %1300 = vmatprep.subr.mxu0 %v1478_v11 }
 0x243   : > { %1301 = vmatpush3.msra.mxu0 %v1412_v10 }
 0x244   : > { %1302 = vmatprep.subr.mxu0 %v1478_v11 }
 0x245   : > { %1303 = vmatpush3.msra.mxu0 %v1414_v13 }
 0x246   : > { %1305 = vmatmul.mubr.f32.vlgmr.msra.gmra.mxu0 %v925_v12 }
 0x306   : > { %v1002_v15 = vpop.f32.mrf.mxu0 }
 0x307   : > { %v1003_v16 = vadd.f32 %v1002_v15, %v934_v14 }
 0x308   : > { %v1306_v17 = vpop.f32.mrf.mxu0 }
 0x309   : > { %1006 = vst [vmem:[%s325_s15] sm:$0x3] %v1003_v16 }
 0x30a   : > { %1428 = shalt.err (!%p1425_p5)
}
 0x30b   : > { %s1429_s25 = scalar_lea.hbm %s1836_s19, 32  ;;  %s1433_s9 = scalar_lea.hbm %s1880_s7, 64 }
 0x30c   : > { %p1430_p7 = scmp.ne.s32.totalorder %s1836_s19, %s1429_s25  ;;  %p1434_p12 = scmp.lt.s32.totalorder %s1836_s19, %s1880_s7 }
 0x30d   : > { %p1435_p13 = scmp.lt.s32.totalorder %s1433_s9, %s1429_s25 }
 0x30e   : > { %p1431_p10 = pnand %p1430_p7, %p1562_p6 }
 0x30f   : > { %p1436_p0 = por %p1435_p13, %p1434_p12 }
 0x310   : > { %p1432_p11 = pneg %p1431_p10 }
 0x312   : > { %p1437_p1 = pnand %p1436_p0, %p1432_p11 }
 0x314   : > { %1440 = shalt.err (!%p1437_p1)
}
 0x315   : > { %1307 = dma.vmem_to_hbm [thread:$0]  (%p1562_p6), %s1022_s16, 32, %s1836_s19, %s1008_s20  }
 0x316 PF: > { %s1033_s15 = sand.u32 1, %s1463_s26   ;;  %p1310_p2 = pnand %p1088_p9, %p1566_p8 }
 0x317   : > { %s1034_s17 = scalar_lea.sflag [#allocation5], %s1033_s15 }
 0x318   : > { %p1311_p3 = pneg %p1310_p2 }
 0x31a   : > { %1458 = dma.done.wait (%p1311_p3), %s1034_s17, 32  }
 0x31b   : > { %1460 = vsyncadd (%p1311_p3), %s1034_s17, 4294967264  ;;  %p19_p4 = scmp.ge.s32.totalorder %s1547_s8, 4   ;;  %s1883_s26 = smov %s1467_s27 }
 0x31c   : > { %s1884_s27 = smov %s1471_s28  ;;  %s1885_s28 = smov %s1560_s11 }
 0x31d   : > { %s1886_s29 = smov %s1547_s8  ;;  %21 = sbr.rel (!%p19_p4) target bundleno = 6 (0x6), region = 126 }
 0x322   :  { %1039 = vsyncpa [#allocation5], 1 }
 0x323   :  { %1041 = vsyncpa [#allocation5 + $0x1], 1 }

</bundles_post_ra>
